<compile_context>
chip_gen: v7x
topology: tpu7x:2x2x1
jax: 0.10.0
libtpu: 0.0.40
codegen_flags: <defaults>
</compile_context>

<pallas_src>
import jax
import jax.numpy as jnp
from jax.experimental import pallas as pl
from jax.experimental.pallas import tpu as pltpu


def _bn_scale_kernel(x_ref, g_ref, o_ref):
    # x_ref: (TM, TK); g_ref: (1, TK); o_ref: (TM, TK)
    x = x_ref[...].astype(jnp.float32)
    g = g_ref[...]  # float32, broadcasts over rows
    o_ref[...] = (x * g).astype(o_ref.dtype)


def _choose_tiles(m, k, itemsize, sublane, vmem_budget_bytes=8 * 1024 * 1024):
    """Largest (tile_m, tile_k) whose double-buffered in+out fits the budget."""
    # ~4 * tile_m * tile_k * itemsize = (in + out) * double-buffer
    bytes_per_row_full_k = 4 * k * itemsize
    max_rows_full_k = vmem_budget_bytes // max(bytes_per_row_full_k, 1)
    if max_rows_full_k >= m:
        return m, k                       # everything in one (or per-M) block
    if max_rows_full_k >= sublane:
        tile_m = (max_rows_full_k // sublane) * sublane
        return min(tile_m, m), k          # tile rows only, full-K lanes
    # K too wide even for `sublane` rows: tile the lane axis as well.
    tile_m = min(m, sublane)
    max_lanes = vmem_budget_bytes // max(4 * tile_m * itemsize, 1)
    tile_k = max(128, (max_lanes // 128) * 128)
    return tile_m, min(tile_k, k)


def pim_bn_forward(x, scale, var, *, eps=1e-5):
    """Pallas equivalent of pim_cpp.bn_forward(input, scale, var)."""
    if x.ndim not in (2, 3):
        raise ValueError("PIM_BatchNorm1d expects (N, C) or (N, C, L) input")

    # Fold the tiny per-channel normalization factor on the host.
    gamma = scale.astype(jnp.float32) / jnp.sqrt(var.astype(jnp.float32) + eps)

    if x.ndim == 2:
        n, c = x.shape
        x2d = x                                  # (N, C): channels on lanes
        gamma_k = gamma                          # (C,)
    else:
        n, c, l = x.shape
        x2d = x.reshape(n, c * l)                # contiguous reshape, no copy
        gamma_k = jnp.repeat(gamma, l)           # (C*L,): per-lane scale

    m, k = x2d.shape
    g2d = gamma_k[None, :].astype(jnp.float32)   # (1, K)

    itemsize = x.dtype.itemsize
    sublane = {4: 8, 2: 16, 1: 32}.get(itemsize, 8)

    tile_m, tile_k = _choose_tiles(m, k, itemsize, sublane)
    grid_k = pl.cdiv(k, tile_k)
    grid_m = pl.cdiv(m, tile_m)

    out2d = pl.pallas_call(
        _bn_scale_kernel,
        out_shape=jax.ShapeDtypeStruct((m, k), x.dtype),
        grid_spec=pltpu.PrefetchScalarGridSpec(
            num_scalar_prefetch=0,
            grid=(grid_k, grid_m),  # gamma (indexed by j) varies only on outer axis
            in_specs=[
                pl.BlockSpec((tile_m, tile_k), lambda j, i: (i, j)),  # x tile
                pl.BlockSpec((1, tile_k), lambda j, i: (0, j)),       # gamma row
            ],
            out_specs=pl.BlockSpec((tile_m, tile_k), lambda j, i: (i, j)),
        ),
        compiler_params=pltpu.CompilerParams(
            dimension_semantics=("parallel", "parallel"),
        ),
        cost_estimate=pl.CostEstimate(
            flops=m * k,
            transcendentals=0,
            bytes_accessed=2 * m * k * itemsize + k * 4,
        ),
    )(x2d, g2d)

    return out2d.reshape(x.shape)


class PIMBatchNorm1d:
    """JAX/Pallas port of PIM_BatchNorm1d."""

    def __init__(self, in_features, key=None):
        if key is None:
            key = jax.random.PRNGKey(0)
        k1, k2 = jax.random.split(key)
        self.in_features = in_features
        self.scale = jax.random.normal(k1, (in_features,), jnp.float32)
        # torch module draws `var` from randn as well; keep it positive here so
        # the 1/sqrt(var + eps) normalization stays finite in the demo.
        self.var = jnp.abs(jax.random.normal(k2, (in_features,), jnp.float32)) + 0.5

    def __call__(self, x):
        return pim_bn_forward(x, self.scale, self.var)


if __name__ == "__main__":
    key = jax.random.PRNGKey(0)
    kx3, kx2, kp = jax.random.split(key, 3)

    in_features = 4
    mod = PIMBatchNorm1d(in_features, key=kp)
    gamma = mod.scale / jnp.sqrt(mod.var + 1e-5)

    # (N, C, L) input — the common BatchNorm1d layout.
    x3 = jax.random.normal(kx3, (2, in_features, 16), dtype=jnp.float32)
    y3 = jax.block_until_ready(mod(x3))
    y3_ref = x3 * gamma[None, :, None]
    assert y3.shape == x3.shape, y3.shape
    assert jnp.allclose(y3, y3_ref, atol=1e-5, rtol=1e-5)

    # (N, C) input path.
    x2 = jax.random.normal(kx2, (8, in_features), dtype=jnp.float32)
    y2 = jax.block_until_ready(mod(x2))
    y2_ref = x2 * gamma[None, :]
    assert y2.shape == x2.shape, y2.shape
    assert jnp.allclose(y2, y2_ref, atol=1e-5, rtol=1e-5)

    print("KERNEL_OK")
</pallas_src>

<mosaic_0001>
module attributes {stable_mosaic.version = 11 : i64} {
  func.func @_bn_scale_kernel(%arg0: i32, %arg1: i32, %arg2: memref<2x64xf32, #tpu.memory_space<vmem>>, %arg3: memref<1x64xf32, #tpu.memory_space<vmem>>, %arg4: memref<2x64xf32, #tpu.memory_space<vmem>>) attributes {dimension_semantics = [#tpu.dimension_semantics<parallel>, #tpu.dimension_semantics<parallel>], iteration_bounds = array<i64: 1, 1>, scalar_prefetch = 0 : i64, scratch_operands = 0 : i64, tpu.core_type = #tpu.core_type<tc>, window_params = [{transform_indices = @transform_0, window_bounds = array<i64: 2, 64>}, {transform_indices = @transform_1, window_bounds = array<i64: 1, 64>}, {transform_indices = @transform_2, window_bounds = array<i64: 2, 64>}]} {
    %c0 = arith.constant 0 : index
    %c0_0 = arith.constant 0 : index
    %0 = vector.load %arg2[%c0, %c0_0] : memref<2x64xf32, #tpu.memory_space<vmem>>, vector<2x64xf32>
    %c0_1 = arith.constant 0 : index
    %c0_2 = arith.constant 0 : index
    %1 = vector.load %arg3[%c0_1, %c0_2] : memref<1x64xf32, #tpu.memory_space<vmem>>, vector<1x64xf32>
    %2 = vector.broadcast %1 : vector<1x64xf32> to vector<2x64xf32>
    %3 = arith.mulf %0, %2 : vector<2x64xf32>
    %c0_3 = arith.constant 0 : index
    %c0_4 = arith.constant 0 : index
    %4 = vector.load %arg4[%c0_3, %c0_4] : memref<2x64xf32, #tpu.memory_space<vmem>>, vector<2x64xf32>
    tpu.vector_store %arg4[%c0_3, %c0_4], %3 {strides = array<i32>} : memref<2x64xf32, #tpu.memory_space<vmem>>, vector<2x64xf32>,
    return
  }
  func.func @transform_0(%arg0: i32, %arg1: i32) -> (i32, i32) {
    %c0_i32 = arith.constant 0 : i32
    return %arg1, %arg0 : i32, i32
  }
  func.func @transform_1(%arg0: i32, %arg1: i32) -> (i32, i32) {
    %c0_i32 = arith.constant 0 : i32
    %c0_i32_0 = arith.constant 0 : i32
    return %c0_i32, %arg0 : i32, i32
  }
  func.func @transform_2(%arg0: i32, %arg1: i32) -> (i32, i32) {
    %c0_i32 = arith.constant 0 : i32
    return %arg1, %arg0 : i32, i32
  }
}

</mosaic_0001>

<bundles_post_ra>
// kernel: tpu_custom_call.1
= control target key start
LH: loop header
LB: loop body
LE: loop exit
PB: predicated region body
PF: predicated region fallthrough
CT: control target
= control target key end

     0   :  { %7 = vsyncpa [#allocation3], 0  ;;  %s145_s0 = inlined_call_operand.hbm [shape: f32[2,64], index: 0, kind: input, shape index: {}]   ;;  %s146_s1 = inlined_call_operand.vmem [shape: f32[1,64], index: 1, kind: input, shape index: {}]   ;;  %s147_s2 = inlined_call_operand.hbm [shape: f32[2,64], index: 2, kind: output, shape index: {}]  }
   0x1   :  { %8 = vsyncpa [#allocation4], 0  ;;  %s101_s9 = smov [#allocation2]   ;;  %s53_s13 = scalar_lea.hbm %s145_s0, 32 }
   0x2   :  { %s15_s10 = sshll.u32 %s101_s9, 4  ;;  %p54_p0 = scmp.ne.s32.totalorder %s145_s0, %s53_s13  ;;  %s16_s10 = int_to_ptr.vmem [resolvable:$true] %s15_s10 }
   0x3   :  { %p57_p1 = scmp.lt.u32.totalorder %s53_s13, %s145_s0 }
   0x5   :  { %p59_p2 = pnand %p57_p1, %p54_p0 }
   0x7   :  { %62 = shalt.err (!%p59_p2)
}
   0x8   :  { %s63_s18 = scalar_lea.vmem %s16_s10, 32  ;;  %p68_p4 = scmp.lt.s32.totalorder %s16_s10, %s16_s10 }
   0x9   :  { %p64_p3 = scmp.ne.s32.totalorder %s16_s10, %s63_s18  ;;  %p69_p5 = scmp.lt.s32.totalorder %s63_s18, %s63_s18 }
   0xb   :  { %p70_p6 = por %p69_p5, %p68_p4 }
   0xd   :  { %p71_p7 = pnand %p70_p6, %p64_p3 }
   0xf   :  { %74 = shalt.err (!%p71_p7)
}
  0x10   :  { %18 = dma.hbm_to_vmem [thread:$0]  %s145_s0, 32, %s16_s10, [#allocation3]  }
  0x11   :  { %97 = dma.done.wait [#allocation3], 32  }
  0x12   :  { %98 = vsyncadd [#allocation3], 4294967264  ;;  %s102_s21 = smov [#allocation5]   ;;  %v24_v0 = vld [vmem:[#allocation2] sm:$0x3]  ;;  %vm33_vm0 = vcmask 517120  }
  0x13   :  { %s41_s22 = sshll.u32 %s102_s21, 4  ;;  %v50_v1 = vld [vmem:[%s146_s1] ss:$0 sm:$0xff]  ;;  %s42_s22 = int_to_ptr.vmem [resolvable:$true] %s41_s22 }
  0x14   :  { %v32_v2 = vmul.f32 %v50_v1, %v24_v0  ;;  %s75_s25 = scalar_lea.vmem %s42_s22, 32  ;;  %p80_p9 = scmp.lt.s32.totalorder %s42_s22, %s42_s22 }
  0x15   :  { %p76_p8 = scmp.ne.s32.totalorder %s42_s22, %s75_s25  ;;  %p81_p10 = scmp.lt.s32.totalorder %s75_s25, %s75_s25 }
  0x16   :  { %34 = vst.msk [vmem:[#allocation5] sm:$0x3] %vm33_vm0, %v32_v2 }
  0x17   :  { %p82_p11 = por %p81_p10, %p80_p9 }
  0x19   :  { %p83_p12 = pnand %p82_p11, %p76_p8 }
  0x1b   :  { %86 = shalt.err (!%p83_p12)
}
  0x1c   :  { %s87_s27 = scalar_lea.hbm %s147_s2, 32 }
  0x1d   :  { %p88_p13 = scmp.ne.s32.totalorder %s147_s2, %s87_s27  ;;  %p91_p0 = scmp.lt.u32.totalorder %s87_s27, %s147_s2 }
  0x1f   :  { %p93_p1 = pnand %p91_p0, %p88_p13 }
  0x21   :  { %96 = shalt.err (!%p93_p1)
}
  0x22   :  { %44 = dma.vmem_to_hbm [thread:$0]  %s42_s22, 32, %s147_s2, [#allocation4]  }
  0x23   :  { %99 = dma.done.wait [#allocation4], 32  }
  0x24   :  { %100 = vsyncadd [#allocation4], 4294967264 }
  0x25   :  { %48 = vsyncpa [#allocation3], 1 }
  0x26   :  { %49 = vsyncpa [#allocation4], 1 }

</bundles_post_ra>
